<compile_context>
chip_gen: v5e
topology: v5e:2x2
jax: 0.10.0
libtpu: 0.0.40
codegen_flags: <defaults>
</compile_context>

<pallas_src>
from functools import partial

import jax
import jax.numpy as jnp
import numpy as np
from jax.experimental import pallas as pl
from jax.experimental.pallas import tpu as pltpu

LENGTH_SEQUENCE = 40
SIZE_PATTERN = 3
L1 = LENGTH_SEQUENCE - (SIZE_PATTERN - 1)   # 38  (after conv1)
L2 = L1 - (SIZE_PATTERN - 1)                # 36  (after conv2)
FC_IN = 2 * L2                              # 72  (fc input features)
FLAT = 4 * LENGTH_SEQUENCE                  # 160 (flattened network input)


def _round_up(n, m):
    return ((n + m - 1) // m) * m


# --------------------------------------------------------------------------
# Kernel: one batch tile of the folded network:  relu(x_tile @ W_eff + b_eff)
# --------------------------------------------------------------------------
def convnet_kernel(x_ref, w_ref, b_ref, out_ref):
    """
    x_ref  : VMEM (TB, 160)   x dtype  flattened inputs for this batch tile
    w_ref  : VMEM (1, 160)    x dtype  folded effective weight (row vector)
    b_ref  : SMEM (1, 1)      f32      folded effective bias
    out_ref: VMEM (1, 1, TB)  f32      lane-dense outputs for this tile
    """
    # Contract the feature axis of both operands -> (1, TB); TB sits on the
    # lane axis so the store below is a full, unmasked vst.
    y = jax.lax.dot_general(
        w_ref[...], x_ref[...],
        dimension_numbers=(((1,), (1,)), ((), ())),
        preferred_element_type=jnp.float32,
    )
    out_ref[0] = jnp.maximum(y + b_ref[0, 0], 0.0)


# --------------------------------------------------------------------------
# Weight folding (done once per weight set, OUTSIDE the forward path)
# --------------------------------------------------------------------------
def _affine_ref(x, params):
    """conv1 -> conv2 -> flatten -> fc (everything before the ReLU)."""
    w1, b1, w2, b2, wf, bf = params
    dn = ("NCH", "OIH", "NCH")
    y1 = jax.lax.conv_general_dilated(
        x, w1.reshape(1, 4, SIZE_PATTERN), (1,), "VALID", dimension_numbers=dn
    ) + b1[None, :, None]
    y2 = jax.lax.conv_general_dilated(
        y1, w2.reshape(2, 1, SIZE_PATTERN), (1,), "VALID", dimension_numbers=dn
    ) + b2[None, :, None]
    return y2.reshape(x.shape[0], FC_IN) @ wf.T + bf[None, :]


def fold_params(params):
    """Collapse the three linear stages into one affine map on the flattened
    (C*L = 160) input. Returns (w_eff, b_eff) of shapes (1, 160), (1, 1).
    Call this once per weight set and pass the result to convnet_forward."""
    zero = jnp.zeros((1, 4, LENGTH_SEQUENCE), jnp.float32)
    b_eff = _affine_ref(zero, params)                                    # (1, 1)
    basis = jnp.eye(FLAT, dtype=jnp.float32).reshape(FLAT, 4, LENGTH_SEQUENCE)
    w_eff = (_affine_ref(basis, params) - b_eff).T                       # (1, 160)
    return w_eff, b_eff


# --------------------------------------------------------------------------
# Tile selection: big tiles to amortize grid-step overhead, but >= 2 tiles
# when B allows it so the parallel axis spans both v7x TensorCores.
# --------------------------------------------------------------------------
def _select_tile_b(B, max_tile_b):
    half = _round_up(max((B + 1) // 2, 1), 128)
    return max(128, min(max_tile_b, half))


# --------------------------------------------------------------------------
# Forward wrapper: grid over batch tiles (no input padding, partial last tile)
# --------------------------------------------------------------------------
@partial(jax.jit, static_argnames=("max_tile_b",))
def convnet_forward(x, w_eff, b_eff, *, max_tile_b=8192):
    B = x.shape[0]
    x_flat = x.reshape(B, FLAT)                 # keep caller dtype (f32 or bf16)
    w = w_eff.astype(x_flat.dtype)              # tiny (160 elems); keeps dot homogeneous
    b = b_eff.astype(jnp.float32)

    TB = _select_tile_b(B, max_tile_b)
    n_tiles = pl.cdiv(B, TB)                    # last tile may be partial; no jnp.pad

    itemsize = jnp.dtype(x_flat.dtype).itemsize
    cost = pl.CostEstimate(
        flops=2 * B * FLAT,
        transcendentals=0,
        bytes_accessed=B * FLAT * itemsize + FLAT * itemsize + n_tiles * TB * 4,
    )

    out = pl.pallas_call(
        convnet_kernel,
        out_shape=jax.ShapeDtypeStruct((n_tiles, 1, TB), jnp.float32),
        grid=(n_tiles,),
        in_specs=[
            # x tile: pipelined (double-buffered). In VMEM each row is lane-
            # padded 160 -> 256, so budget 2 * TB * 256 * itemsize.
            # TODO(synk): optionally sweep pipeline_mode=pl.Buffered(3) on v7x.
            pl.BlockSpec((TB, FLAT), lambda i: (i, 0)),
            pl.BlockSpec((1, FLAT), lambda i: (0, 0)),             # W_eff (resident)
            pl.BlockSpec((1, 1), lambda i: (0, 0),
                         memory_space=pltpu.MemorySpace.SMEM),     # b_eff scalar
        ],
        out_specs=pl.BlockSpec((1, 1, TB), lambda i: (i, 0, 0)),
        compiler_params=pltpu.CompilerParams(
            dimension_semantics=("parallel",),   # shard batch tiles across TCs (v7x)
            # 2*8192*256*4 B ~= 16.8 MiB of x buffers + small out/weight buffers:
            # fits the 32 MiB scoped limit on all gens (v7x physical = 64 MiB);
            # set explicitly so v5e's 16 MiB default doesn't reject large TB.
            vmem_limit_bytes=32 * 1024 * 1024,
        ),
        cost_estimate=cost,
    )(x_flat, w, b)

    return out.reshape(-1)[:B].reshape(B, 1)


# --------------------------------------------------------------------------
# Params + pure-JAX reference (mirrors the PyTorch forward)
# --------------------------------------------------------------------------
def init_params(key):
    ks = jax.random.split(key, 6)

    def u(k, shape, fan_in):
        bound = 1.0 / np.sqrt(fan_in)
        return jax.random.uniform(k, shape, jnp.float32, -bound, bound)

    w1 = u(ks[0], (4, SIZE_PATTERN), 4 * SIZE_PATTERN)   # conv1.weight (1,4,3) squeezed
    b1 = u(ks[1], (1,), 4 * SIZE_PATTERN)                # conv1.bias
    w2 = u(ks[2], (2, SIZE_PATTERN), 1 * SIZE_PATTERN)   # conv2.weight (2,1,3) squeezed
    b2 = u(ks[3], (2,), 1 * SIZE_PATTERN)                # conv2.bias
    wf = u(ks[4], (1, FC_IN), FC_IN)                     # fc.weight
    bf = u(ks[5], (1,), FC_IN)                           # fc.bias
    return (w1, b1, w2, b2, wf, bf)


def convnet_ref(x, params):
    return jnp.maximum(_affine_ref(x, params), 0.0)


if __name__ == "__main__":
    key = jax.random.PRNGKey(0)
    kx, kp = jax.random.split(key)

    params = init_params(kp)
    # Folding is hoisted: done once per weight set, outside the forward path.
    w_eff, b_eff = fold_params(params)
    w_eff, b_eff = jax.block_until_ready((w_eff, b_eff))

    # Primary small-shape check (batch=2, channels=4, length=40).
    B = 2
    x = jax.random.normal(kx, (B, 4, LENGTH_SEQUENCE), jnp.float32)
    out = jax.block_until_ready(convnet_forward(x, w_eff, b_eff))
    ref = convnet_ref(x, params)
    np.testing.assert_allclose(np.asarray(out), np.asarray(ref), rtol=1e-4, atol=1e-4)

    # Secondary check exercising the no-pad path: multiple tiles + partial tail.
    B2 = 300
    x2 = jax.random.normal(jax.random.PRNGKey(1), (B2, 4, LENGTH_SEQUENCE), jnp.float32)
    out2 = jax.block_until_ready(convnet_forward(x2, w_eff, b_eff, max_tile_b=256))
    ref2 = convnet_ref(x2, params)
    np.testing.assert_allclose(np.asarray(out2), np.asarray(ref2), rtol=1e-4, atol=1e-4)

    print("KERNEL_OK")
</pallas_src>

<mosaic_0001>
module attributes {stable_mosaic.version = 11 : i64} {
  func.func @convnet_kernel(%arg0: i32, %arg1: memref<128x160xf32, #tpu.memory_space<vmem>>, %arg2: memref<1x160xf32, #tpu.memory_space<vmem>>, %arg3: memref<1x1xf32, #tpu.memory_space<smem>>, %arg4: memref<1x1x128xf32, #tpu.memory_space<vmem>>) attributes {dimension_semantics = [#tpu.dimension_semantics<parallel>], iteration_bounds = array<i64: 1>, scalar_prefetch = 0 : i64, scratch_operands = 0 : i64, tpu.core_type = #tpu.core_type<tc>, window_params = [{transform_indices = @transform_0, window_bounds = array<i64: 128, 160>}, {pipeline_mode = #tpu.pipeline_mode<synchronous>, transform_indices = @transform_1, window_bounds = array<i64: 1, 160>}, {transform_indices = @transform_2, window_bounds = array<i64: 1, 1>}, {transform_indices = @transform_3, window_bounds = array<i64: 1, 1, 128>}]} {
    %c0 = arith.constant 0 : index
    %c0_0 = arith.constant 0 : index
    %0 = vector.load %arg2[%c0, %c0_0] : memref<1x160xf32, #tpu.memory_space<vmem>>, vector<1x160xf32>
    %c0_1 = arith.constant 0 : index
    %c0_2 = arith.constant 0 : index
    %1 = vector.load %arg1[%c0_1, %c0_2] : memref<128x160xf32, #tpu.memory_space<vmem>>, vector<128x160xf32>
    %cst = arith.constant dense<0.000000e+00> : vector<1x128xf32>
    %2 = tpu.matmul %0, %1, %cst {dimension_numbers = #tpu.dot_dimension_numbers<[1], [1], [0], [0], [0, 0, 1, 0], [], []>} : vector<1x160xf32>, vector<128x160xf32>, vector<1x128xf32> -> vector<1x128xf32>
    %c0_3 = arith.constant 0 : index
    %c0_4 = arith.constant 0 : index
    %3 = memref.load %arg3[%c0_3, %c0_4] : memref<1x1xf32, #tpu.memory_space<smem>>
    %4 = vector.broadcast %3 : f32 to vector<1x128xf32>
    %5 = arith.addf %2, %4 : vector<1x128xf32>
    %cst_5 = arith.constant 0.000000e+00 : f32
    %6 = vector.broadcast %cst_5 : f32 to vector<1x128xf32>
    %7 = arith.maximumf %5, %6 : vector<1x128xf32>
    %c0_6 = arith.constant 0 : index
    %c0_7 = arith.constant 0 : index
    %c0_8 = arith.constant 0 : index
    %8 = vector.load %arg4[%c0_6, %c0_7, %c0_8] : memref<1x1x128xf32, #tpu.memory_space<vmem>>, vector<1x1x128xf32>
    %9 = vector.shape_cast %8 : vector<1x1x128xf32> to vector<1x128xf32>
    %10 = vector.shape_cast %7 : vector<1x128xf32> to vector<1x1x128xf32>
    tpu.vector_store %arg4[%c0_6, %c0_7, %c0_8], %10 {strides = array<i32>} : memref<1x1x128xf32, #tpu.memory_space<vmem>>, vector<1x1x128xf32>,
    return
  }
  func.func @transform_0(%arg0: i32) -> (i32, i32) {
    %c0_i32 = arith.constant 0 : i32
    %c0_i32_0 = arith.constant 0 : i32
    return %arg0, %c0_i32 : i32, i32
  }
  func.func @transform_1(%arg0: i32) -> (i32, i32) {
    %c0_i32 = arith.constant 0 : i32
    %c0_i32_0 = arith.constant 0 : i32
    %c0_i32_1 = arith.constant 0 : i32
    return %c0_i32, %c0_i32_0 : i32, i32
  }
  func.func @transform_2(%arg0: i32) -> (i32, i32) {
    %c0_i32 = arith.constant 0 : i32
    %c0_i32_0 = arith.constant 0 : i32
    %c0_i32_1 = arith.constant 0 : i32
    return %c0_i32, %c0_i32_0 : i32, i32
  }
  func.func @transform_3(%arg0: i32) -> (i32, i32, i32) {
    %c0_i32 = arith.constant 0 : i32
    %c0_i32_0 = arith.constant 0 : i32
    %c0_i32_1 = arith.constant 0 : i32
    return %arg0, %c0_i32, %c0_i32_0 : i32, i32, i32
  }
}

</mosaic_0001>

<bundles_post_ra>
// kernel: convnet_forward.1
= control target key start
LH: loop header
LB: loop body
LE: loop exit
PB: predicated region body
PF: predicated region fallthrough
CT: control target
= control target key end

     0   :  { %vm269_vm0 = vcmask 261120   ;;  %s659_s0 = inlined_call_operand.vmem [shape: f32[2,160], index: 0, kind: input, shape index: {}]   ;;  %s660_s1 = inlined_call_operand.vmem [shape: f32[1,160], index: 1, kind: input, shape index: {}]   ;;  %s661_s2 = inlined_call_operand.<no memory space> [shape: f32[1,1], index: 2, kind: input, shape index: {}]   ;;  %s662_s3 = inlined_call_operand.vmem [shape: f32[1,1,128], index: 3, kind: output, shape index: {}]  }
   0x1   :  { %v20_v0 = vld [vmem:[%s659_s0 + $0x10] sm:$0xf]  ;;  %v21_v1 = vld [vmem:[%s659_s0 + $0x14] sm:$0xf]  ;;  %v22_v2 = vld [vmem:[%s659_s0 + $0x18] sm:$0xf] }
   0x2   :  { %v23_v3 = vld [vmem:[%s659_s0 + $0x1c] sm:$0xf]  ;;  %158 = vst [vmem:[#allocation1 + $0x20] ss:$4 sm:$0xff] %v20_v0  ;;  %v16_v4 = vld [vmem:[%s659_s0] sm:$0xf] }
   0x3   :  { %160 = vst [vmem:[#allocation1 + $0x21] ss:$4 sm:$0xff] %v21_v1  ;;  %v17_v5 = vld [vmem:[%s659_s0 + $0x4] sm:$0xf]  ;;  %v18_v6 = vld [vmem:[%s659_s0 + $0x8] sm:$0xf] }
   0x4   :  { %162 = vst [vmem:[#allocation1 + $0x22] ss:$4 sm:$0xff] %v22_v2  ;;  %v19_v7 = vld [vmem:[%s659_s0 + $0xc] sm:$0xf]  ;;  %v28_v8 = vld [vmem:[%s659_s0 + $0x30] sm:$0xf] }
   0x5   :  { %164 = vst [vmem:[#allocation1 + $0x23] ss:$4 sm:$0xff] %v23_v3  ;;  %v29_v9 = vld [vmem:[%s659_s0 + $0x34] sm:$0xf]  ;;  %v30_v10 = vld [vmem:[%s659_s0 + $0x38] sm:$0xf] }
   0x6   :  { %150 = vst [vmem:[#allocation1] ss:$4 sm:$0xff] %v16_v4  ;;  %v31_v13 = vld [vmem:[%s659_s0 + $0x3c] sm:$0xf]  ;;  %v24_v14 = vld [vmem:[%s659_s0 + $0x20] sm:$0xf] }
   0x7   :  { %152 = vst [vmem:[#allocation1 + $0x1] ss:$4 sm:$0xff] %v17_v5  ;;  %v25_v15 = vld [vmem:[%s659_s0 + $0x24] sm:$0xf]  ;;  %v26_v17 = vld [vmem:[%s659_s0 + $0x28] sm:$0xf] }
   0x8   :  { %154 = vst [vmem:[#allocation1 + $0x2] ss:$4 sm:$0xff] %v18_v6  ;;  %v27_v19 = vld [vmem:[%s659_s0 + $0x2c] sm:$0xf]  ;;  %v36_v20 = vld [vmem:[%s659_s0 + $0x50] sm:$0xf] }
   0x9   :  { %156 = vst [vmem:[#allocation1 + $0x3] ss:$4 sm:$0xff] %v19_v7  ;;  %v37_v21 = vld [vmem:[%s659_s0 + $0x54] sm:$0xf]  ;;  %v38_v22 = vld [vmem:[%s659_s0 + $0x58] sm:$0xf] }
   0xa   :  { %v39_v25 = vld [vmem:[%s659_s0 + $0x5c] sm:$0xf]  ;;  %v32_v26 = vld [vmem:[%s659_s0 + $0x40] sm:$0xf]  ;;  %v33_v27 = vld [vmem:[%s659_s0 + $0x44] sm:$0xf] }
   0xb   :  { %v44_v30 = vld [vmem:[%s659_s0 + $0x70] sm:$0xf]  ;;  %v45_v31 = vld [vmem:[%s659_s0 + $0x74] sm:$0xf]  ;;  %v46_v32 = vld [vmem:[%s659_s0 + $0x78] sm:$0xf] }
   0xc   :  { %v420_v11 = vld.sshfl [vmem:[#allocation1 + $0x20] sm:$0xff pattern:$0x73625140]  ;;  %v422_v12 = vld.sshfl [vmem:[#allocation1 + $0x28] sm:$0xff pattern:$0x73625140] }
   0xd   :  { %173 = vst [vmem:[#allocation1 + $0x20] ss:$4 sm:$0xff] %v28_v8  ;;  %v47_v35 = vld [vmem:[%s659_s0 + $0x7c] sm:$0xf]  ;;  %v34_v36 = vld [vmem:[%s659_s0 + $0x48] sm:$0xf] }
   0xe   :  { %174 = vst [vmem:[#allocation1 + $0x21] ss:$4 sm:$0xff] %v29_v9  ;;  %v35_v37 = vld [vmem:[%s659_s0 + $0x4c] sm:$0xf]  ;;  %v52_v38 = vld [vmem:[%s659_s0 + $0x90] sm:$0xf] }
   0xf   :  { %175 = vst [vmem:[#allocation1 + $0x22] ss:$4 sm:$0xff] %v30_v10  ;;  %v53_v39 = vld [vmem:[%s659_s0 + $0x94] sm:$0xf]  ;;  %v54_v40 = vld [vmem:[%s659_s0 + $0x98] sm:$0xf] }
  0x10   :  { %176 = vst [vmem:[#allocation1 + $0x23] ss:$4 sm:$0xff] %v31_v13  ;;  %v433_v16 = vld.sshfl [vmem:[#allocation1] sm:$0xff pattern:$0x73625140] }
  0x11   :  { %v438_v18 = vld.sshfl [vmem:[#allocation1 + $0x8] sm:$0xff pattern:$0x73625140]  ;;  %v55_v43 = vld [vmem:[%s659_s0 + $0x9c] sm:$0xf] }
  0x12   :  { %169 = vst [vmem:[#allocation1] ss:$4 sm:$0xff] %v24_v14  ;;  %v40_v44 = vld [vmem:[%s659_s0 + $0x60] sm:$0xf]  ;;  %v41_v45 = vld [vmem:[%s659_s0 + $0x64] sm:$0xf] }
  0x13   :  { %170 = vst [vmem:[#allocation1 + $0x1] ss:$4 sm:$0xff] %v25_v15  ;;  %v42_v46 = vld [vmem:[%s659_s0 + $0x68] sm:$0xf]  ;;  %v43_v49 = vld [vmem:[%s659_s0 + $0x6c] sm:$0xf] }
  0x14   :  { %171 = vst [vmem:[#allocation1 + $0x2] ss:$4 sm:$0xff] %v26_v17  ;;  %v60_v50 = vld [vmem:[%s659_s0 + $0xb0] sm:$0xf]  ;;  %v61_v51 = vld [vmem:[%s659_s0 + $0xb4] sm:$0xf] }
  0x15   :  { %172 = vst [vmem:[#allocation1 + $0x3] ss:$4 sm:$0xff] %v27_v19  ;;  %v62_v52 = vld [vmem:[%s659_s0 + $0xb8] sm:$0xf]  ;;  %v63_v55 = vld [vmem:[%s659_s0 + $0xbc] sm:$0xf] }
  0x16   :  { %v48_v56 = vld [vmem:[%s659_s0 + $0x80] sm:$0xf]  ;;  %v49_v57 = vld [vmem:[%s659_s0 + $0x84] sm:$0xf]  ;;  %v50_v58 = vld [vmem:[%s659_s0 + $0x88] sm:$0xf] }
  0x17   :  { %v452_v23 = vld.sshfl [vmem:[#allocation1 + $0x20] sm:$0xff pattern:$0x73625140]  ;;  %v454_v24 = vld.sshfl [vmem:[#allocation1 + $0x28] sm:$0xff pattern:$0x73625140] }
  0x18   :  { %185 = vst [vmem:[#allocation1 + $0x20] ss:$4 sm:$0xff] %v36_v20  ;;  %v51_v61 = vld [vmem:[%s659_s0 + $0x8c] sm:$0xf]  ;;  %v68_v62 = vld [vmem:[%s659_s0 + $0xd0] sm:$0xf] }
  0x19   :  { %186 = vst [vmem:[#allocation1 + $0x21] ss:$4 sm:$0xff] %v37_v21  ;;  %v69_v63 = vld [vmem:[%s659_s0 + $0xd4] sm:$0xf]  ;;  %v70_v0 = vld [vmem:[%s659_s0 + $0xd8] sm:$0xf] }
  0x1a   :  { %187 = vst [vmem:[#allocation1 + $0x22] ss:$4 sm:$0xff] %v38_v22  ;;  %v71_v3 = vld [vmem:[%s659_s0 + $0xdc] sm:$0xf]  ;;  %v56_v4 = vld [vmem:[%s659_s0 + $0xa0] sm:$0xf] }
  0x1b   :  { %188 = vst [vmem:[#allocation1 + $0x23] ss:$4 sm:$0xff] %v39_v25  ;;  %v57_v5 = vld [vmem:[%s659_s0 + $0xa4] sm:$0xf]  ;;  %v58_v6 = vld [vmem:[%s659_s0 + $0xa8] sm:$0xf] }
  0x1c   :  { %v465_v28 = vld.sshfl [vmem:[#allocation1] sm:$0xff pattern:$0x73625140]  ;;  %v467_v29 = vld.sshfl [vmem:[#allocation1 + $0x8] sm:$0xff pattern:$0x73625140] }
  0x1d   :  { %181 = vst [vmem:[#allocation1] ss:$4 sm:$0xff] %v32_v26  ;;  %v59_v9 = vld [vmem:[%s659_s0 + $0xac] sm:$0xf]  ;;  %v76_v10 = vld [vmem:[%s659_s0 + $0xf0] sm:$0xf] }
  0x1e   :  { %182 = vst [vmem:[#allocation1 + $0x1] ss:$4 sm:$0xff] %v33_v27  ;;  %v77_v13 = vld [vmem:[%s659_s0 + $0xf4] sm:$0xf]  ;;  %v78_v14 = vld [vmem:[%s659_s0 + $0xf8] sm:$0xf] }
  0x1f   :  { %183 = vst [vmem:[#allocation1 + $0x2] ss:$4 sm:$0xff] %v34_v36  ;;  %v79_v19 = vld [vmem:[%s659_s0 + $0xfc] sm:$0xf]  ;;  %v64_v20 = vld [vmem:[%s659_s0 + $0xc0] sm:$0xf] }
  0x20   :  { %184 = vst [vmem:[#allocation1 + $0x3] ss:$4 sm:$0xff] %v35_v37  ;;  %v65_v21 = vld [vmem:[%s659_s0 + $0xc4] sm:$0xf]  ;;  %v66_v22 = vld [vmem:[%s659_s0 + $0xc8] sm:$0xf] }
  0x21   :  { %v67_v27 = vld [vmem:[%s659_s0 + $0xcc] sm:$0xf]  ;;  %v74_v36 = vld [vmem:[%s659_s0 + $0xe8] sm:$0xf] }
  0x22   :  { %v478_v33 = vld.sshfl [vmem:[#allocation1 + $0x20] sm:$0xff pattern:$0x73625140]  ;;  %v480_v34 = vld.sshfl [vmem:[#allocation1 + $0x28] sm:$0xff pattern:$0x73625140] }
  0x23   :  { %197 = vst [vmem:[#allocation1 + $0x20] ss:$4 sm:$0xff] %v44_v30 }
  0x24   :  { %198 = vst [vmem:[#allocation1 + $0x21] ss:$4 sm:$0xff] %v45_v31 }
  0x25   :  { %199 = vst [vmem:[#allocation1 + $0x22] ss:$4 sm:$0xff] %v46_v32  ;;  %v72_v32 = vld [vmem:[%s659_s0 + $0xe0] sm:$0xf] }
  0x26   :  { %200 = vst [vmem:[#allocation1 + $0x23] ss:$4 sm:$0xff] %v47_v35  ;;  %v73_v35 = vld [vmem:[%s659_s0 + $0xe4] sm:$0xf] }
  0x27   :  { %v516_v47 = vld.sshfl [vmem:[#allocation1] sm:$0xff pattern:$0x73625140]  ;;  %v518_v48 = vld.sshfl [vmem:[#allocation1 + $0x8] sm:$0xff pattern:$0x73625140] }
  0x28   :  { %193 = vst [vmem:[#allocation1] ss:$4 sm:$0xff] %v40_v44 }
  0x29   :  { %194 = vst [vmem:[#allocation1 + $0x1] ss:$4 sm:$0xff] %v41_v45 }
  0x2a   :  { %195 = vst [vmem:[#allocation1 + $0x2] ss:$4 sm:$0xff] %v42_v46 }
  0x2b   :  { %196 = vst [vmem:[#allocation1 + $0x3] ss:$4 sm:$0xff] %v43_v49 }
  0x2d   :  { %v500_v41 = vld.sshfl [vmem:[#allocation1 + $0x20] sm:$0xff pattern:$0x73625140]  ;;  %v502_v42 = vld.sshfl [vmem:[#allocation1 + $0x28] sm:$0xff pattern:$0x73625140] }
  0x2e   :  { %209 = vst [vmem:[#allocation1 + $0x20] ss:$4 sm:$0xff] %v52_v38 }
  0x2f   :  { %210 = vst [vmem:[#allocation1 + $0x21] ss:$4 sm:$0xff] %v53_v39  ;;  %v75_v39 = vld [vmem:[%s659_s0 + $0xec] sm:$0xf] }
  0x30   :  { %211 = vst [vmem:[#allocation1 + $0x22] ss:$4 sm:$0xff] %v54_v40 }
  0x31   :  { %212 = vst [vmem:[#allocation1 + $0x23] ss:$4 sm:$0xff] %v55_v43 }
  0x32   :  { %v548_v59 = vld.sshfl [vmem:[#allocation1] sm:$0xff pattern:$0x73625140]  ;;  %v550_v60 = vld.sshfl [vmem:[#allocation1 + $0x8] sm:$0xff pattern:$0x73625140] }
  0x33   :  { %205 = vst [vmem:[#allocation1] ss:$4 sm:$0xff] %v48_v56 }
  0x34   :  { %206 = vst [vmem:[#allocation1 + $0x1] ss:$4 sm:$0xff] %v49_v57 }
  0x35   :  { %207 = vst [vmem:[#allocation1 + $0x2] ss:$4 sm:$0xff] %v50_v58 }
  0x36   :  { %208 = vst [vmem:[#allocation1 + $0x3] ss:$4 sm:$0xff] %v51_v61 }
  0x38   :  { %v532_v53 = vld.sshfl [vmem:[#allocation1 + $0x20] sm:$0xff pattern:$0x73625140]  ;;  %v534_v54 = vld.sshfl [vmem:[#allocation1 + $0x28] sm:$0xff pattern:$0x73625140] }
  0x39   :  { %221 = vst [vmem:[#allocation1 + $0x20] ss:$4 sm:$0xff] %v60_v50 }
  0x3a   :  { %222 = vst [vmem:[#allocation1 + $0x21] ss:$4 sm:$0xff] %v61_v51 }
  0x3b   :  { %223 = vst [vmem:[#allocation1 + $0x22] ss:$4 sm:$0xff] %v62_v52 }
  0x3c   :  { %224 = vst [vmem:[#allocation1 + $0x23] ss:$4 sm:$0xff] %v63_v55 }
  0x3d   :  { %v213_v7 = vld.sshfl [vmem:[#allocation1] sm:$0xff pattern:$0x73625140]  ;;  %v214_v8 = vld.sshfl [vmem:[#allocation1 + $0x8] sm:$0xff pattern:$0x73625140] }
  0x3e   :  { %217 = vst [vmem:[#allocation1] ss:$4 sm:$0xff] %v56_v4 }
  0x3f   :  { %218 = vst [vmem:[#allocation1 + $0x1] ss:$4 sm:$0xff] %v57_v5 }
  0x40   :  { %219 = vst [vmem:[#allocation1 + $0x2] ss:$4 sm:$0xff] %v58_v6 }
  0x41   :  { %220 = vst [vmem:[#allocation1 + $0x3] ss:$4 sm:$0xff] %v59_v9 }
  0x43   :  { %v227_v1 = vld.sshfl [vmem:[#allocation1 + $0x20] sm:$0xff pattern:$0x73625140]  ;;  %v228_v2 = vld.sshfl [vmem:[#allocation1 + $0x28] sm:$0xff pattern:$0x73625140] }
  0x44   :  { %233 = vst [vmem:[#allocation1 + $0x20] ss:$4 sm:$0xff] %v68_v62 }
  0x45   :  { %234 = vst [vmem:[#allocation1 + $0x21] ss:$4 sm:$0xff] %v69_v63 }
  0x46   :  { %235 = vst [vmem:[#allocation1 + $0x22] ss:$4 sm:$0xff] %v70_v0 }
  0x47   :  { %236 = vst [vmem:[#allocation1 + $0x23] ss:$4 sm:$0xff] %v71_v3 }
  0x48   :  { %v225_v25 = vld.sshfl [vmem:[#allocation1] sm:$0xff pattern:$0x73625140]  ;;  %v226_v26 = vld.sshfl [vmem:[#allocation1 + $0x8] sm:$0xff pattern:$0x73625140] }
  0x49   :  { %229 = vst [vmem:[#allocation1] ss:$4 sm:$0xff] %v64_v20 }
  0x4a   :  { %230 = vst [vmem:[#allocation1 + $0x1] ss:$4 sm:$0xff] %v65_v21 }
  0x4b   :  { %231 = vst [vmem:[#allocation1 + $0x2] ss:$4 sm:$0xff] %v66_v22 }
  0x4c   :  { %232 = vst [vmem:[#allocation1 + $0x3] ss:$4 sm:$0xff] %v67_v27 }
  0x4e   :  { %v239_v15 = vld.sshfl [vmem:[#allocation1 + $0x20] sm:$0xff pattern:$0x73625140]  ;;  %v240_v17 = vld.sshfl [vmem:[#allocation1 + $0x28] sm:$0xff pattern:$0x73625140] }
  0x4f   :  { %245 = vst [vmem:[#allocation1 + $0x20] ss:$4 sm:$0xff] %v76_v10 }
  0x50   :  { %246 = vst [vmem:[#allocation1 + $0x21] ss:$4 sm:$0xff] %v77_v13 }
  0x51   :  { %247 = vst [vmem:[#allocation1 + $0x22] ss:$4 sm:$0xff] %v78_v14 }
  0x52   :  { %248 = vst [vmem:[#allocation1 + $0x23] ss:$4 sm:$0xff] %v79_v19 }
  0x53   :  { %v237_v37 = vld.sshfl [vmem:[#allocation1] sm:$0xff pattern:$0x73625140]  ;;  %v238_v38 = vld.sshfl [vmem:[#allocation1 + $0x8] sm:$0xff pattern:$0x73625140] }
  0x54   :  { %241 = vst [vmem:[#allocation1] ss:$4 sm:$0xff] %v72_v32 }
  0x55   :  { %242 = vst [vmem:[#allocation1 + $0x1] ss:$4 sm:$0xff] %v73_v35 }
  0x56   :  { %243 = vst [vmem:[#allocation1 + $0x2] ss:$4 sm:$0xff] %v74_v36 }
  0x57   :  { %244 = vst [vmem:[#allocation1 + $0x3] ss:$4 sm:$0xff] %v75_v39 }
  0x59   :  { %v251_v30 = vld.sshfl [vmem:[#allocation1 + $0x20] sm:$0xff pattern:$0x73625140]  ;;  %v252_v31 = vld.sshfl [vmem:[#allocation1 + $0x28] sm:$0xff pattern:$0x73625140] }
  0x5a   :  { %304 = vmatpush.xpose.msra.mxu0 %v251_v30  ;;  %350 = vmatpush.xpose.msk.msra.mxu1 %vm269_vm0, %v252_v31 }
  0x5e   :  { %v249_v40 = vld.sshfl [vmem:[#allocation1] sm:$0xff pattern:$0x73625140]  ;;  %v250_v43 = vld.sshfl [vmem:[#allocation1 + $0x8] sm:$0xff pattern:$0x73625140] }
  0x5f   :  { %305 = vmatpush.xpose.msra.mxu0 %v249_v40  ;;  %351 = vmatpush.xpose.msk.msra.mxu1 %vm269_vm0, %v250_v43 }
  0x63   :  { %306 = vmatpush.xpose.msra.mxu0 %v239_v15  ;;  %352 = vmatpush.xpose.msk.msra.mxu1 %vm269_vm0, %v240_v17 }
  0x67   :  { %307 = vmatpush.xpose.msra.mxu0 %v237_v37  ;;  %353 = vmatpush.xpose.msk.msra.mxu1 %vm269_vm0, %v238_v38 }
  0x6b   :  { %308 = vmatpush.xpose.msra.mxu0 %v227_v1  ;;  %354 = vmatpush.xpose.msk.msra.mxu1 %vm269_vm0, %v228_v2 }
  0x6f   :  { %309 = vmatpush.xpose.msra.mxu0 %v225_v25  ;;  %355 = vmatpush.xpose.msk.msra.mxu1 %vm269_vm0, %v226_v26 }
  0x73   :  { %310 = vmatpush.xpose.msra.mxu0 %v532_v53  ;;  %356 = vmatpush.xpose.msk.msra.mxu1 %vm269_vm0, %v534_v54 }
  0x77   :  { %311 = vmatpush.xpose.msra.mxu0 %v213_v7  ;;  %357 = vmatpush.xpose.msk.msra.mxu1 %vm269_vm0, %v214_v8 }
  0x7b   :  { %312 = vmatpush.xpose.msra.mxu0 %v500_v41  ;;  %358 = vmatpush.xpose.msk.msra.mxu1 %vm269_vm0, %v502_v42 }
  0x7f   :  { %313 = vmatpush.xpose.msra.mxu0 %v548_v59  ;;  %359 = vmatpush.xpose.msk.msra.mxu1 %vm269_vm0, %v550_v60 }
  0x83   :  { %314 = vmatpush.xpose.msra.mxu0 %v478_v33  ;;  %360 = vmatpush.xpose.msk.msra.mxu1 %vm269_vm0, %v480_v34  ;;  %v15_v33 = vld [vmem:[%s660_s1] sm:$0x3] }
  0x84   :  { %v83_v34 = vperm.slane %v15_v33, 0  ;;  %v84_v41 = vperm.slane %v15_v33, 1 }
  0x87   :  { %315 = vmatpush.xpose.msra.mxu0 %v516_v47  ;;  %361 = vmatpush.xpose.msk.msra.mxu1 %vm269_vm0, %v518_v48 }
  0x8b   :  { %316 = vmatpush.xpose.msra.mxu0 %v452_v23  ;;  %362 = vmatpush.xpose.msk.msra.mxu1 %vm269_vm0, %v454_v24 }
  0x8f   :  { %317 = vmatpush.xpose.msra.mxu0 %v465_v28  ;;  %363 = vmatpush.xpose.msk.msra.mxu1 %vm269_vm0, %v467_v29 }
  0x93   :  { %318 = vmatpush.xpose.msra.mxu0 %v420_v11  ;;  %364 = vmatpush.xpose.msk.msra.mxu1 %vm269_vm0, %v422_v12  ;;  %v81_v11 = vstv %s661_s2 }
  0x97   :  { %319 = vmatpush.xpose.msra.mxu0 %v433_v16  ;;  %365 = vmatpush.xpose.msk.msra.mxu1 %vm269_vm0, %v438_v18 }
  0x9a   :  { %320 = vmatmul.f32.vlgmr.msra.gmra.mxu0 %v83_v34  ;;  %366 = vmatmul.msk.f32.vlgmr.msra.gmra.mxu1 %vm269_vm0, %v84_v41 }
 0x117   :  { %v321_v23 = vpop.f32.mrf.mxu0  ;;  %v341_v12 = vpop.f32.mrf.mxu1 }
 0x118   :  { %v322_v24 = vadd.f32 %v321_v23, %v81_v11 }
 0x11a   :  { %v342_v28 = vadd.f32 %v341_v12, %v322_v24 }
 0x11c   :  { %v344_v29 = vmax.f32 %v342_v28, 0.0 }
 0x11e   :  { %345 = vst [vmem:[%s662_s3] sm:$0x1] %v344_v29 }

</bundles_post_ra>
